<compile_context>
chip_gen: v6e
topology: v6e:2x2x1
jax: 0.10.0
libtpu: 0.0.40
codegen_flags: <defaults>
</compile_context>

<pallas_src>
import functools

import numpy as np
import jax
import jax.numpy as jnp
from jax.experimental import pallas as pl
from jax.experimental.pallas import tpu as pltpu

_HPAD = 128        # hidden (64) padded to full lane width inside the kernel
_MAX_TILE = 4096   # max batch rows per grid step (multiple of 128)


def _round_up(n, m):
    return ((n + m - 1) // m) * m


def _has_megacore():
    """True iff the default device shards a 'parallel' grid axis across 2 TCs (v7x)."""
    try:
        kind = jax.devices()[0].device_kind.lower()
    except Exception:
        return False
    return "v7" in kind


# ----------------------------- Pallas kernel ------------------------------ #
def ppo_actor_kernel(x_ref, p_ref, out_ref, *, kp, aout):
    """x_ref: [tile, kp]; p_ref: [kp+280, 128] packed params; out_ref: [aout, tile]."""
    H = _HPAD
    # Static, 8-aligned row slices of the packed parameter slab.
    w1 = p_ref[0:kp, :]                              # [kp, 128]
    b1 = p_ref[kp:kp + 1, :]                         # [1, 128]
    w2 = p_ref[kp + 8:kp + 8 + H, :]                 # [128, 128]
    b2 = p_ref[kp + 8 + H:kp + 9 + H, :]             # [1, 128]
    w3 = p_ref[kp + 16 + H:kp + 16 + 2 * H, :]       # [128, 128]
    b3 = p_ref[kp + 16 + 2 * H:kp + 17 + 2 * H, :]   # [1, 128]

    h1 = jnp.tanh(jnp.dot(x_ref[...], w1, preferred_element_type=jnp.float32) + b1)
    h2 = jnp.tanh(jnp.dot(h1, w2, preferred_element_type=jnp.float32) + b2)
    mean = jnp.dot(h2, w3, preferred_element_type=jnp.float32) + b3   # [tile, 128]

    # Packed, lane-dense writeback: transpose (XLU, idle slot) and keep only the
    # first `aout` sublanes (action_dim padded to a sublane multiple); batch rides
    # on the lane axis so stores are full-width, unmasked vst.
    mean_t = mean.T                                                   # [128, tile]
    out_ref[...] = mean_t[0:aout, :].astype(out_ref.dtype)


# -------------------------- parameter consolidation ------------------------ #
def pack_params(params):
    """Pack W1,b1,W2,b2,W3,b3 into one lane-dense [kp+280, 128] f32 slab.

    Call ONCE whenever the parameters change (hoisted out of the forward path).

    Layout (row offsets are multiples of 8; unused entries are zero, which keeps
    the padded-lane math exact since tanh(0)=0):
      [0, kp)                 : W1  (rows = obs_dim, cols = hidden)
      [kp, kp+8)              : b1  (row kp)
      [kp+8, kp+136)          : W2  (rows/cols = hidden)
      [kp+136, kp+144)        : b2  (row kp+136)
      [kp+144, kp+272)        : W3  (rows = hidden, cols = action_dim)
      [kp+272, kp+280)        : b3  (row kp+272)
    """
    w1, b1, w2, b2, w3, b3, _ = params
    obs_dim, hidden = w1.shape
    action_dim = w3.shape[1]
    assert hidden <= _HPAD and action_dim <= 128
    kp = _round_up(max(obs_dim, 1), 8)
    H = _HPAD
    slab = jnp.zeros((kp + 280, 128), jnp.float32)
    slab = slab.at[:obs_dim, :hidden].set(w1.astype(jnp.float32))
    slab = slab.at[kp, :hidden].set(b1.reshape(-1).astype(jnp.float32))
    slab = slab.at[kp + 8:kp + 8 + hidden, :hidden].set(w2.astype(jnp.float32))
    slab = slab.at[kp + 8 + H, :hidden].set(b2.reshape(-1).astype(jnp.float32))
    slab = slab.at[kp + 16 + H:kp + 16 + H + hidden, :action_dim].set(
        w3.astype(jnp.float32))
    slab = slab.at[kp + 16 + 2 * H, :action_dim].set(
        b3.reshape(-1).astype(jnp.float32))
    return slab


# ------------------------------- wrapper ----------------------------------- #
@functools.partial(jax.jit, static_argnames=("batch_tile",))
def ppo_actor_forward_packed(x, slab, log_std, batch_tile=None):
    """Returns (mean [B, action_dim], std [action_dim]) of the PPOActor Normal."""
    B, obs_dim = x.shape
    kp = slab.shape[0] - 280                      # K as packed into the slab
    action_dim = int(np.prod(log_std.shape))
    aout = _round_up(action_dim, 8)               # action dim padded to sublanes
    assert obs_dim <= kp and aout <= 128

    # --- batch tiling: multiple of 128 (lane-major packed output), cap _MAX_TILE ---
    if batch_tile is None:
        batch_tile = min(_MAX_TILE, _round_up(B, 128))
        # Only split a would-be single-step grid where megacore can use it (v7x).
        if (_has_megacore() and batch_tile >= 256
                and _round_up(B, batch_tile) == batch_tile):
            batch_tile = _round_up(batch_tile // 2, 128)
    assert batch_tile % 128 == 0, "batch_tile must be a multiple of 128"
    Bp = _round_up(B, batch_tile)

    xp = x.astype(jnp.float32)
    if (Bp, kp) != (B, obs_dim):
        xp = jnp.pad(xp, ((0, Bp - B), (0, kp - obs_dim)))

    grid = (Bp // batch_tile,)
    out = pl.pallas_call(
        functools.partial(ppo_actor_kernel, kp=kp, aout=aout),
        grid=grid,
        in_specs=[
            pl.BlockSpec((batch_tile, kp), lambda i: (i, 0)),   # x tile
            pl.BlockSpec((kp + 280, 128), lambda i: (0, 0)),    # packed params (constant)
        ],
        # Lane-dense packed output: [aout, Bp], batch on the lane axis.
        out_specs=pl.BlockSpec((aout, batch_tile), lambda i: (0, i)),
        out_shape=jax.ShapeDtypeStruct((aout, Bp), jnp.float32),
        compiler_params=pltpu.CompilerParams(
            dimension_semantics=("parallel",)),
    )(xp, slab)

    mean = out[:action_dim, :B].T                 # [B, action_dim]
    std = jnp.exp(log_std.reshape(-1))            # data-independent; caller broadcasts
    return mean, std


# ------------------------- deterministic parameter init -------------------- #
def orthogonal_init(key, out_dim, in_dim, gain):
    """Mimics torch.nn.init.orthogonal_ (QR of a Gaussian), deterministic."""
    rows, cols = out_dim, in_dim
    a = jax.random.normal(key, (max(rows, cols), min(rows, cols)), dtype=jnp.float32)
    q, r = jnp.linalg.qr(a)
    q = q * jnp.sign(jnp.diagonal(r))
    if rows < cols:
        q = q.T
    return gain * q[:rows, :cols]                 # PyTorch layout: [out, in]


def make_params(key, obs_dim, action_dim, hidden=64):
    k1, k2, k3 = jax.random.split(key, 3)
    gain = float(np.sqrt(2.0))
    # PyTorch Linear weight is [out, in]; kernel expects [in, out] -> transpose.
    w1 = orthogonal_init(k1, hidden, obs_dim, gain).T          # [obs_dim, 64]
    b1 = jnp.zeros((1, hidden), jnp.float32)
    w2 = orthogonal_init(k2, hidden, hidden, gain).T           # [64, 64]
    b2 = jnp.zeros((1, hidden), jnp.float32)
    w3 = orthogonal_init(k3, action_dim, hidden, 0.01).T       # [64, action_dim]
    b3 = jnp.zeros((1, action_dim), jnp.float32)
    log_std = jnp.zeros((1, action_dim), jnp.float32)          # nn.Parameter(zeros)
    return (w1, b1, w2, b2, w3, b3, log_std)


# ------------------------------ reference ---------------------------------- #
def ppo_actor_ref(x, params):
    w1, b1, w2, b2, w3, b3, log_std = params
    h1 = jnp.tanh(x @ w1 + b1)
    h2 = jnp.tanh(h1 @ w2 + b2)
    mean = h2 @ w3 + b3
    std = jnp.broadcast_to(jnp.exp(log_std), mean.shape)
    return mean, std


if __name__ == "__main__":
    key = jax.random.PRNGKey(0)
    obs_dim, action_dim = 16, 4
    kparam, kx1, kx2, kx3 = jax.random.split(key, 4)
    params = make_params(kparam, obs_dim, action_dim)

    # Pack parameters once (hoisted out of the per-call forward path).
    slab = pack_params(params)
    log_std = params[6]

    cases = (("small", 8, kx1),          # single grid step, padded batch
             ("ragged", 40, kx2),        # batch padding
             ("multi-step", 260, kx3))   # multi-step grid (3 tiles of 128 on 1-TC chips)
    for _, B, kx in cases:
        x = jax.random.normal(kx, (B, obs_dim), dtype=jnp.float32)
        mean, std = ppo_actor_forward_packed(x, slab, log_std)
        jax.block_until_ready((mean, std))
        mean_ref, std_ref = ppo_actor_ref(x, params)
        np.testing.assert_allclose(np.asarray(mean), np.asarray(mean_ref),
                                   rtol=1e-5, atol=1e-5)
        np.testing.assert_allclose(np.asarray(jnp.broadcast_to(std, mean.shape)),
                                   np.asarray(std_ref), rtol=1e-6, atol=1e-6)

    # TODO(synk): the torch.distributions.Normal object itself is not materialized;
    # the kernel returns its parameters (mean, std), matching the forward semantics.
    print("KERNEL_OK")
</pallas_src>

<mosaic_0001>
module attributes {stable_mosaic.version = 11 : i64} {
  func.func @ppo_actor_kernel(%arg0: i32, %arg1: memref<128x16xf32, #tpu.memory_space<vmem>>, %arg2: memref<296x128xf32, #tpu.memory_space<vmem>>, %arg3: memref<8x128xf32, #tpu.memory_space<vmem>>) attributes {dimension_semantics = [#tpu.dimension_semantics<parallel>], iteration_bounds = array<i64: 1>, scalar_prefetch = 0 : i64, scratch_operands = 0 : i64, tpu.core_type = #tpu.core_type<tc>, window_params = [{transform_indices = @transform_0, window_bounds = array<i64: 128, 16>}, {pipeline_mode = #tpu.pipeline_mode<synchronous>, transform_indices = @transform_1, window_bounds = array<i64: 296, 128>}, {transform_indices = @transform_2, window_bounds = array<i64: 8, 128>}]} {
    %c0 = arith.constant 0 : index
    %c0_0 = arith.constant 0 : index
    %0 = vector.load %arg2[%c0, %c0_0] : memref<296x128xf32, #tpu.memory_space<vmem>>, vector<16x128xf32>
    %c16 = arith.constant 16 : index
    %c0_1 = arith.constant 0 : index
    %1 = vector.load %arg2[%c16, %c0_1] : memref<296x128xf32, #tpu.memory_space<vmem>>, vector<1x128xf32>
    %c24 = arith.constant 24 : index
    %c0_2 = arith.constant 0 : index
    %2 = vector.load %arg2[%c24, %c0_2] : memref<296x128xf32, #tpu.memory_space<vmem>>, vector<128x128xf32>
    %c152 = arith.constant 152 : index
    %c0_3 = arith.constant 0 : index
    %3 = vector.load %arg2[%c152, %c0_3] : memref<296x128xf32, #tpu.memory_space<vmem>>, vector<1x128xf32>
    %c160 = arith.constant 160 : index
    %c0_4 = arith.constant 0 : index
    %4 = vector.load %arg2[%c160, %c0_4] : memref<296x128xf32, #tpu.memory_space<vmem>>, vector<128x128xf32>
    %c288 = arith.constant 288 : index
    %c0_5 = arith.constant 0 : index
    %5 = vector.load %arg2[%c288, %c0_5] : memref<296x128xf32, #tpu.memory_space<vmem>>, vector<1x128xf32>
    %c0_6 = arith.constant 0 : index
    %c0_7 = arith.constant 0 : index
    %6 = vector.load %arg1[%c0_6, %c0_7] : memref<128x16xf32, #tpu.memory_space<vmem>>, vector<128x16xf32>
    %cst = arith.constant dense<0.000000e+00> : vector<128x128xf32>
    %7 = tpu.matmul %6, %0, %cst {dimension_numbers = #tpu.dot_dimension_numbers<[1], [0], [0], [1], [0, 0, 1, 1], [], []>} : vector<128x16xf32>, vector<16x128xf32>, vector<128x128xf32> -> vector<128x128xf32>
    %8 = vector.broadcast %1 : vector<1x128xf32> to vector<128x128xf32>
    %9 = arith.addf %7, %8 : vector<128x128xf32>
    %10 = math.tanh %9 : vector<128x128xf32>
    %cst_8 = arith.constant dense<0.000000e+00> : vector<128x128xf32>
    %11 = tpu.matmul %10, %2, %cst_8 {dimension_numbers = #tpu.dot_dimension_numbers<[1], [0], [0], [1], [0, 0, 1, 1], [], []>} : vector<128x128xf32>, vector<128x128xf32>, vector<128x128xf32> -> vector<128x128xf32>
    %12 = vector.broadcast %3 : vector<1x128xf32> to vector<128x128xf32>
    %13 = arith.addf %11, %12 : vector<128x128xf32>
    %14 = math.tanh %13 : vector<128x128xf32>
    %cst_9 = arith.constant dense<0.000000e+00> : vector<128x128xf32>
    %15 = tpu.matmul %14, %4, %cst_9 {dimension_numbers = #tpu.dot_dimension_numbers<[1], [0], [0], [1], [0, 0, 1, 1], [], []>} : vector<128x128xf32>, vector<128x128xf32>, vector<128x128xf32> -> vector<128x128xf32>
    %16 = vector.broadcast %5 : vector<1x128xf32> to vector<128x128xf32>
    %17 = arith.addf %15, %16 : vector<128x128xf32>
    %18 = tpu.transpose %17, [1, 0] : vector<128x128xf32> -> vector<128x128xf32>
    %19 = vector.extract_strided_slice %18 {offsets = [0, 0], sizes = [8, 128], strides = [1, 1]} : vector<128x128xf32> to vector<8x128xf32>
    %c0_10 = arith.constant 0 : index
    %c0_11 = arith.constant 0 : index
    %20 = vector.load %arg3[%c0_10, %c0_11] : memref<8x128xf32, #tpu.memory_space<vmem>>, vector<8x128xf32>
    tpu.vector_store %arg3[%c0_10, %c0_11], %19 {strides = array<i32>} : memref<8x128xf32, #tpu.memory_space<vmem>>, vector<8x128xf32>,
    return
  }
  func.func @transform_0(%arg0: i32) -> (i32, i32) {
    %c0_i32 = arith.constant 0 : i32
    %c0_i32_0 = arith.constant 0 : i32
    return %arg0, %c0_i32 : i32, i32
  }
  func.func @transform_1(%arg0: i32) -> (i32, i32) {
    %c0_i32 = arith.constant 0 : i32
    %c0_i32_0 = arith.constant 0 : i32
    %c0_i32_1 = arith.constant 0 : i32
    return %c0_i32, %c0_i32_0 : i32, i32
  }
  func.func @transform_2(%arg0: i32) -> (i32, i32) {
    %c0_i32 = arith.constant 0 : i32
    %c0_i32_0 = arith.constant 0 : i32
    return %c0_i32, %arg0 : i32, i32
  }
}

</mosaic_0001>

<bundles_post_ra>
// kernel: ppo_actor_forward_packed.1
= control target key start
LH: loop header
LB: loop body
LE: loop exit
PB: predicated region body
PF: predicated region fallthrough
CT: control target
= control target key end

     0   :  { %7 = vsyncpa [#allocation3], 0  ;;  %s974_s9 = smov [#allocation2]   ;;  %s1062_s0 = inlined_call_operand.vmem [shape: f32[128,16], index: 0, kind: input, shape index: {}]   ;;  %s1063_s1 = inlined_call_operand.hbm [shape: f32[296,128], index: 1, kind: input, shape index: {}]   ;;  %s1064_s2 = inlined_call_operand.vmem [shape: f32[8,128], index: 2, kind: output, shape index: {}]  }
   0x1   :  { %s15_s10 = sshll.u32 %s974_s9, 4  ;;  %s16_s10 = int_to_ptr.vmem [resolvable:$true] %s15_s10 }
   0x2   :  { %s960_s11 = scalar_lea.vmem %s16_s10, 4736  ;;  %p965_p1 = scmp.lt.s32.totalorder %s16_s10, %s16_s10 }
   0x3   :  { %p961_p0 = scmp.ne.s32.totalorder %s16_s10, %s960_s11  ;;  %p966_p2 = scmp.lt.s32.totalorder %s960_s11, %s960_s11 }
   0x5   :  { %p967_p3 = por %p966_p2, %p965_p1 }
   0x7   :  { %p968_p4 = pnand %p967_p3, %p961_p0 }
   0x9   :  { %971 = shalt.err (!%p968_p4)
}
   0xa   :  { %s975_s12 = smov 128   ;;  %s976_s13 = smov 8  }
   0xb   :  { %21 = dma.hbm_to_vmem [thread:$0]  %s1063_s1, 4736, %s16_s10, [#allocation3], %s975_s12, %s975_s12, %s976_s13  }
   0xc   :  { %972 = dma.done.wait [#allocation3], 4736  }
   0xd   :  { %973 = vsyncadd [#allocation3], 4294962560  ;;  %vm82_vm0 = vcmask 130048   ;;  %v26_v0 = vld [vmem:[#allocation2 + $0x8] sm:$0xff]  ;;  %v25_v1 = vld [vmem:[#allocation2] sm:$0xff] }
   0xe   :  { %v62_v2 = vld [vmem:[%s1062_s0] sm:$0xff]  ;;  %745 = vmatprep.subr.mxu0 %v26_v0  ;;  %v63_v3 = vld [vmem:[%s1062_s0 + $0x8] sm:$0xff]  ;;  %v64_v4 = vld [vmem:[%s1062_s0 + $0x10] sm:$0xff] }
   0xf   :  { %749 = vmatprep.mubr.msk.f32.mxu0 %vm82_vm0, %v62_v2  ;;  %746 = vmatpush3.msra.mxu0 %v26_v0  ;;  %v65_v5 = vld [vmem:[%s1062_s0 + $0x18] sm:$0xff]  ;;  %v43_v6 = vld [vmem:[#allocation2 + $0x90] sm:$0xff]  ;;  %v42_v7 = vld [vmem:[#allocation2 + $0x88] sm:$0xff] }
  0x10   :  { %747 = vmatprep.subr.mxu0 %v25_v1  ;;  %v66_v8 = vld [vmem:[%s1062_s0 + $0x20] sm:$0xff]  ;;  %773 = vmatprep.subr.mxu1 %v43_v6  ;;  %v67_v10 = vld [vmem:[%s1062_s0 + $0x28] sm:$0xff]  ;;  %v40_v11 = vld [vmem:[#allocation2 + $0x78] sm:$0xff] }
  0x11   :  { %748 = vmatpush3.msra.mxu0 %v25_v1  ;;  %774 = vmatpush3.msra.mxu1 %v43_v6  ;;  %v41_v9 = vld [vmem:[#allocation2 + $0x80] sm:$0xff]  ;;  %v68_v12 = vld [vmem:[%s1062_s0 + $0x30] sm:$0xff]  ;;  %v69_v14 = vld [vmem:[%s1062_s0 + $0x38] sm:$0xff] }
  0x12   :  { %750 = vmatmul.mubr.msk.f32.vlgmr.msra.gmra.mxu0 %vm82_vm0, %v63_v3  ;;  %775 = vmatprep.subr.mxu1 %v42_v7  ;;  %v39_v13 = vld [vmem:[#allocation2 + $0x70] sm:$0xff]  ;;  %v38_v15 = vld [vmem:[#allocation2 + $0x68] sm:$0xff]  ;;  %v70_v16 = vld [vmem:[%s1062_s0 + $0x40] sm:$0xff] }
  0x13   :  { %752 = vmatprep.mubr.msk.f32.mxu0 %vm82_vm0, %v64_v4  ;;  %776 = vmatpush3.msra.mxu1 %v42_v7  ;;  %v71_v17 = vld [vmem:[%s1062_s0 + $0x48] sm:$0xff]  ;;  %v72_v18 = vld [vmem:[%s1062_s0 + $0x50] sm:$0xff]  ;;  %v73_v19 = vld [vmem:[%s1062_s0 + $0x58] sm:$0xff] }
  0x14   :  { %777 = vmatprep.subr.mxu1 %v41_v9  ;;  %v74_v20 = vld [vmem:[%s1062_s0 + $0x60] sm:$0xff]  ;;  %v75_v21 = vld [vmem:[%s1062_s0 + $0x68] sm:$0xff]  ;;  %v76_v22 = vld [vmem:[%s1062_s0 + $0x70] sm:$0xff] }
  0x15   :  { %778 = vmatpush3.msra.mxu1 %v41_v9  ;;  %v77_v23 = vld [vmem:[%s1062_s0 + $0x78] sm:$0xff]  ;;  %v37_v24 = vld [vmem:[#allocation2 + $0x60] sm:$0xff]  ;;  %v35_v26 = vld [vmem:[#allocation2 + $0x50] sm:$0xff] }
  0x16   :  { %753 = vmatmul.mubr.msk.f32.gmra.mxu0 %vm82_vm0, %v65_v5  ;;  %779 = vmatprep.subr.mxu1 %v40_v11  ;;  %v36_v25 = vld [vmem:[#allocation2 + $0x58] sm:$0xff]  ;;  %v34_v27 = vld [vmem:[#allocation2 + $0x48] sm:$0xff]  ;;  %v33_v28 = vld [vmem:[#allocation2 + $0x40] sm:$0xff] }
  0x17   :  { %755 = vmatprep.mubr.msk.f32.mxu0 %vm82_vm0, %v66_v8  ;;  %780 = vmatpush3.msra.mxu1 %v40_v11  ;;  %v32_v29 = vld [vmem:[#allocation2 + $0x38] sm:$0xff]  ;;  %v31_v30 = vld [vmem:[#allocation2 + $0x30] sm:$0xff]  ;;  %v30_v31 = vld [vmem:[#allocation2 + $0x28] sm:$0xff] }
  0x18   :  { %781 = vmatprep.subr.mxu1 %v39_v13  ;;  %v29_v32 = vld [vmem:[#allocation2 + $0x20] sm:$0xff]  ;;  %v28_v33 = vld [vmem:[#allocation2 + $0x18] sm:$0xff]  ;;  %v59_v35 = vld [vmem:[#allocation2 + $0x110] sm:$0xff] }
  0x19   :  { %782 = vmatpush3.msra.mxu1 %v39_v13  ;;  %v60_v34 = vld [vmem:[#allocation2 + $0x118] sm:$0xff]  ;;  %v58_v36 = vld [vmem:[#allocation2 + $0x108] sm:$0xff]  ;;  %v57_v37 = vld [vmem:[#allocation2 + $0x100] sm:$0xff] }
  0x1a   :  { %756 = vmatmul.mubr.msk.f32.gmra.mxu0 %vm82_vm0, %v67_v10  ;;  %783 = vmatprep.subr.mxu1 %v38_v15  ;;  %v56_v38 = vld [vmem:[#allocation2 + $0xf8] sm:$0xff]  ;;  %v55_v39 = vld [vmem:[#allocation2 + $0xf0] sm:$0xff]  ;;  %v54_v40 = vld [vmem:[#allocation2 + $0xe8] sm:$0xff] }
  0x1b   :  { %758 = vmatprep.mubr.msk.f32.mxu0 %vm82_vm0, %v68_v12  ;;  %784 = vmatpush3.msra.mxu1 %v38_v15  ;;  %v644_v41 = vld [vmem:[#allocation2 + $0x10] ss:$0 sm:$0xff] }
  0x1c   :  { %785 = vmatprep.subr.mxu1 %v37_v24  ;;  %829 = vmatprep.subr.mxu0 %v60_v34 }
  0x1d   :  { %786 = vmatpush3.msra.mxu1 %v37_v24  ;;  %830 = vmatpush3.msra.mxu0 %v60_v34  ;;  %v45_v34 = vld [vmem:[#allocation2 + $0xa0] sm:$0xff] }
  0x1e   :  { %759 = vmatmul.mubr.msk.f32.gmra.mxu0 %vm82_vm0, %v69_v14  ;;  %787 = vmatprep.subr.mxu1 %v36_v25 }
  0x1f   :  { %761 = vmatprep.mubr.msk.f32.mxu0 %vm82_vm0, %v70_v16  ;;  %788 = vmatpush3.msra.mxu1 %v36_v25 }
  0x20   :  { %789 = vmatprep.subr.mxu1 %v35_v26  ;;  %831 = vmatprep.subr.mxu0 %v59_v35 }
  0x21   :  { %790 = vmatpush3.msra.mxu1 %v35_v26  ;;  %832 = vmatpush3.msra.mxu0 %v59_v35  ;;  %v53_v26 = vld [vmem:[#allocation2 + $0xe0] sm:$0xff]  ;;  %v661_v35 = vld [vmem:[#allocation2 + $0x98] ss:$0 sm:$0xff] }
  0x22   :  { %762 = vmatmul.mubr.msk.f32.gmra.mxu0 %vm82_vm0, %v71_v17  ;;  %791 = vmatprep.subr.mxu1 %v34_v27 }
  0x23   :  { %764 = vmatprep.mubr.msk.f32.mxu0 %vm82_vm0, %v72_v18  ;;  %792 = vmatpush3.msra.mxu1 %v34_v27  ;;  %v52_v27 = vld [vmem:[#allocation2 + $0xd8] sm:$0xff] }
  0x24   :  { %793 = vmatprep.subr.mxu1 %v33_v28  ;;  %833 = vmatprep.subr.mxu0 %v58_v36 }
  0x25   :  { %794 = vmatpush3.msra.mxu1 %v33_v28  ;;  %834 = vmatpush3.msra.mxu0 %v58_v36  ;;  %v51_v28 = vld [vmem:[#allocation2 + $0xd0] sm:$0xff] }
  0x26   :  { %765 = vmatmul.mubr.msk.f32.gmra.mxu0 %vm82_vm0, %v73_v19  ;;  %795 = vmatprep.subr.mxu1 %v32_v29 }
  0x27   :  { %767 = vmatprep.mubr.msk.f32.mxu0 %vm82_vm0, %v74_v20  ;;  %796 = vmatpush3.msra.mxu1 %v32_v29  ;;  %v50_v29 = vld [vmem:[#allocation2 + $0xc8] sm:$0xff] }
  0x28   :  { %797 = vmatprep.subr.mxu1 %v31_v30  ;;  %835 = vmatprep.subr.mxu0 %v57_v37 }
  0x29   :  { %798 = vmatpush3.msra.mxu1 %v31_v30  ;;  %836 = vmatpush3.msra.mxu0 %v57_v37  ;;  %v49_v30 = vld [vmem:[#allocation2 + $0xc0] sm:$0xff] }
  0x2a   :  { %768 = vmatmul.mubr.msk.f32.gmra.mxu0 %vm82_vm0, %v75_v21  ;;  %799 = vmatprep.subr.mxu1 %v30_v31 }
  0x2b   :  { %770 = vmatprep.mubr.msk.f32.mxu0 %vm82_vm0, %v76_v22  ;;  %800 = vmatpush3.msra.mxu1 %v30_v31  ;;  %v48_v31 = vld [vmem:[#allocation2 + $0xb8] sm:$0xff] }
  0x2c   :  { %801 = vmatprep.subr.mxu1 %v29_v32  ;;  %837 = vmatprep.subr.mxu0 %v56_v38 }
  0x2d   :  { %802 = vmatpush3.msra.mxu1 %v29_v32  ;;  %838 = vmatpush3.msra.mxu0 %v56_v38  ;;  %v47_v32 = vld [vmem:[#allocation2 + $0xb0] sm:$0xff] }
  0x2e   :  { %771 = vmatmul.mubr.msk.f32.gmra.mxu0 %vm82_vm0, %v77_v23  ;;  %803 = vmatprep.subr.mxu1 %v28_v33 }
  0x2f   :  { %804 = vmatpush3.msra.mxu1 %v28_v33  ;;  %839 = vmatprep.subr.mxu0 %v55_v39  ;;  %v46_v33 = vld [vmem:[#allocation2 + $0xa8] sm:$0xff] }
  0x30   :  { %840 = vmatpush3.msra.mxu0 %v55_v39 }
  0x31   :  { %841 = vmatprep.subr.mxu0 %v54_v40 }
  0x32   :  { %842 = vmatpush3.msra.mxu0 %v54_v40 }
  0x33   :  { %843 = vmatprep.subr.mxu0 %v53_v26 }
  0x34   :  { %844 = vmatpush3.msra.mxu0 %v53_v26 }
  0x35   :  { %845 = vmatprep.subr.mxu0 %v52_v27 }
  0x36   :  { %846 = vmatpush3.msra.mxu0 %v52_v27 }
  0x37   :  { %847 = vmatprep.subr.mxu0 %v51_v28 }
  0x38   :  { %848 = vmatpush3.msra.mxu0 %v51_v28 }
  0x39   :  { %849 = vmatprep.subr.mxu0 %v50_v29 }
  0x3a   :  { %850 = vmatpush3.msra.mxu0 %v50_v29 }
  0x3b   :  { %851 = vmatprep.subr.mxu0 %v49_v30 }
  0x3c   :  { %852 = vmatpush3.msra.mxu0 %v49_v30 }
  0x3d   :  { %853 = vmatprep.subr.mxu0 %v48_v31 }
  0x3e   :  { %854 = vmatpush3.msra.mxu0 %v48_v31 }
  0x3f   :  { %855 = vmatprep.subr.mxu0 %v47_v32 }
  0x40   :  { %856 = vmatpush3.msra.mxu0 %v47_v32 }
  0x41   :  { %857 = vmatprep.subr.mxu0 %v46_v33 }
  0x42   :  { %858 = vmatpush3.msra.mxu0 %v46_v33 }
  0x43   :  { %859 = vmatprep.subr.mxu0 %v45_v34 }
  0x44   :  { %860 = vmatpush3.msra.mxu0 %v45_v34 }
  0xd2   :  { %v751_v42 = vpop.f32.mrf.mxu0 }
  0xd3   :  { %v203_v43 = vadd.f32 %v751_v42, %v644_v41 }
  0xd4   :  { %v197_v44 = vpop.f32.mrf.mxu0 }
  0xd5   :  { %v198_v45 = vadd.f32 %v644_v41, %v197_v44 }
  0xd6   :  { %v754_v46 = vpop.f32.mrf.mxu0 }
  0xd7   :  { %888 = vtanh.f32 %v198_v45  ;;  %v213_v47 = vadd.f32 %v754_v46, %v644_v41 }
  0xd8   :  { %890 = vtanh.f32 %v203_v43  ;;  %v207_v48 = vpop.f32.mrf.mxu0 }
  0xd9   :  { %v208_v49 = vadd.f32 %v644_v41, %v207_v48  ;;  %892 = vtanh.f32 %v213_v47 }
  0xda   :  { %v757_v50 = vpop.f32.mrf.mxu0 }
  0xdb   :  { %894 = vtanh.f32 %v208_v49  ;;  %v223_v51 = vadd.f32 %v757_v50, %v644_v41 }
  0xdc   :  { %v217_v52 = vpop.f32.mrf.mxu0 }
  0xdd   :  { %v218_v53 = vadd.f32 %v644_v41, %v217_v52  ;;  %896 = vtanh.f32 %v223_v51 }
  0xde   :  { %v760_v54 = vpop.f32.mrf.mxu0 }
  0xdf   :  { %898 = vtanh.f32 %v218_v53  ;;  %v233_v55 = vadd.f32 %v760_v54, %v644_v41 }
  0xe0   :  { %v227_v56 = vpop.f32.mrf.mxu0 }
  0xe1   :  { %v228_v57 = vadd.f32 %v644_v41, %v227_v56  ;;  %900 = vtanh.f32 %v233_v55 }
  0xe2   :  { %v763_v58 = vpop.f32.mrf.mxu0 }
  0xe3   :  { %902 = vtanh.f32 %v228_v57  ;;  %v243_v59 = vadd.f32 %v763_v58, %v644_v41 }
  0xe4   :  { %v889_v60 = vpop.eup %888  ;;  %v237_v61 = vpop.f32.mrf.mxu0 }
  0xe5   :  { %v891_v62 = vpop.eup %890  ;;  %805 = vmatprep.mubr.f32.mxu1 %v889_v60  ;;  %v238_v63 = vadd.f32 %v644_v41, %v237_v61  ;;  %904 = vtanh.f32 %v243_v59 }
  0xe6   :  { %806 = vmatmul.mubr.f32.vlgmr.msra.gmra.mxu1 %v891_v62  ;;  %v766_v0 = vpop.f32.mrf.mxu0  ;;  %v893_v1 = vpop.eup %892 }
  0xe7   :  { %906 = vtanh.f32 %v238_v63  ;;  %v253_v2 = vadd.f32 %v766_v0, %v644_v41 }
  0xe8   :  { %v895_v3 = vpop.eup %894  ;;  %v247_v4 = vpop.f32.mrf.mxu0 }
  0xe9   :  { %808 = vmatprep.mubr.f32.mxu1 %v895_v3  ;;  %v248_v5 = vadd.f32 %v644_v41, %v247_v4  ;;  %908 = vtanh.f32 %v253_v2 }
  0xea   :  { %809 = vmatmul.mubr.f32.gmra.mxu1 %v893_v1  ;;  %v769_v6 = vpop.f32.mrf.mxu0  ;;  %v897_v7 = vpop.eup %896 }
  0xeb   :  { %910 = vtanh.f32 %v248_v5  ;;  %v263_v8 = vadd.f32 %v769_v6, %v644_v41 }
  0xec   :  { %v899_v9 = vpop.eup %898  ;;  %v257_v10 = vpop.f32.mrf.mxu0 }
  0xed   :  { %811 = vmatprep.mubr.f32.mxu1 %v899_v9  ;;  %v258_v11 = vadd.f32 %v644_v41, %v257_v10  ;;  %912 = vtanh.f32 %v263_v8 }
  0xee   :  { %812 = vmatmul.mubr.f32.gmra.mxu1 %v897_v7  ;;  %v772_v12 = vpop.f32.mrf.mxu0  ;;  %v901_v13 = vpop.eup %900 }
  0xef   :  { %914 = vtanh.f32 %v258_v11  ;;  %v273_v14 = vadd.f32 %v772_v12, %v644_v41 }
  0xf0   :  { %v903_v15 = vpop.eup %902  ;;  %v267_v16 = vpop.f32.mrf.mxu0 }
  0xf1   :  { %814 = vmatprep.mubr.f32.mxu1 %v903_v15  ;;  %v268_v17 = vadd.f32 %v644_v41, %v267_v16  ;;  %916 = vtanh.f32 %v273_v14 }
  0xf2   :  { %815 = vmatmul.mubr.f32.gmra.mxu1 %v901_v13  ;;  %v905_v18 = vpop.eup %904 }
  0xf3   :  { %918 = vtanh.f32 %v268_v17 }
  0xf4   :  { %v907_v19 = vpop.eup %906 }
  0xf5   :  { %817 = vmatprep.mubr.f32.mxu1 %v907_v19 }
  0xf6   :  { %818 = vmatmul.mubr.f32.gmra.mxu1 %v905_v18  ;;  %v909_v20 = vpop.eup %908 }
  0xf8   :  { %v911_v21 = vpop.eup %910 }
  0xf9   :  { %820 = vmatprep.mubr.f32.mxu1 %v911_v21  ;;  %v662_v21 = vld [vmem:[#allocation2 + $0x120] ss:$0 sm:$0xff] }
  0xfa   :  { %821 = vmatmul.mubr.f32.gmra.mxu1 %v909_v20  ;;  %v913_v22 = vpop.eup %912 }
  0xfc   :  { %v915_v23 = vpop.eup %914 }
  0xfd   :  { %823 = vmatprep.mubr.f32.mxu1 %v915_v23 }
  0xfe   :  { %824 = vmatmul.mubr.f32.gmra.mxu1 %v913_v22  ;;  %v917_v24 = vpop.eup %916 }
 0x100   :  { %v919_v25 = vpop.eup %918 }
 0x101   :  { %826 = vmatprep.mubr.f32.mxu1 %v919_v25 }
 0x102   :  { %827 = vmatmul.mubr.f32.gmra.mxu1 %v917_v24 }
 0x1a6   :  { %v807_v36 = vpop.f32.mrf.mxu1 }
 0x1a7   :  { %v368_v37 = vadd.f32 %v807_v36, %v661_v35 }
 0x1a8   :  { %v362_v38 = vpop.f32.mrf.mxu1 }
 0x1a9   :  { %v363_v39 = vadd.f32 %v661_v35, %v362_v38 }
 0x1aa   :  { %v810_v40 = vpop.f32.mrf.mxu1 }
 0x1ab   :  { %920 = vtanh.f32 %v363_v39  ;;  %v378_v41 = vadd.f32 %v810_v40, %v661_v35 }
 0x1ac   :  { %922 = vtanh.f32 %v368_v37  ;;  %v372_v42 = vpop.f32.mrf.mxu1 }
 0x1ad   :  { %v373_v43 = vadd.f32 %v661_v35, %v372_v42 }
 0x1ae   :  { %v813_v44 = vpop.f32.mrf.mxu1 }
 0x1af   :  { %924 = vtanh.f32 %v373_v43  ;;  %v388_v45 = vadd.f32 %v813_v44, %v661_v35 }
 0x1b0   :  { %926 = vtanh.f32 %v378_v41  ;;  %v382_v46 = vpop.f32.mrf.mxu1 }
 0x1b1   :  { %v383_v47 = vadd.f32 %v661_v35, %v382_v46  ;;  %928 = vtanh.f32 %v388_v45 }
 0x1b2   :  { %v816_v48 = vpop.f32.mrf.mxu1 }
 0x1b3   :  { %930 = vtanh.f32 %v383_v47  ;;  %v398_v49 = vadd.f32 %v816_v48, %v661_v35 }
 0x1b4   :  { %v392_v50 = vpop.f32.mrf.mxu1 }
 0x1b5   :  { %v393_v51 = vadd.f32 %v661_v35, %v392_v50  ;;  %932 = vtanh.f32 %v398_v49 }
 0x1b6   :  { %v819_v52 = vpop.f32.mrf.mxu1 }
 0x1b7   :  { %934 = vtanh.f32 %v393_v51  ;;  %v408_v53 = vadd.f32 %v819_v52, %v661_v35 }
 0x1b8   :  { %v921_v54 = vpop.eup %920  ;;  %v402_v55 = vpop.f32.mrf.mxu1 }
 0x1b9   :  { %v923_v56 = vpop.eup %922  ;;  %861 = vmatprep.mubr.f32.mxu0 %v921_v54  ;;  %v403_v57 = vadd.f32 %v661_v35, %v402_v55  ;;  %936 = vtanh.f32 %v408_v53 }
 0x1ba   :  { %862 = vmatmul.mubr.f32.vlgmr.msra.gmra.mxu0 %v923_v56  ;;  %v822_v58 = vpop.f32.mrf.mxu1 }
 0x1bb   :  { %938 = vtanh.f32 %v403_v57  ;;  %v418_v59 = vadd.f32 %v822_v58, %v661_v35 }
 0x1bc   :  { %v925_v60 = vpop.eup %924  ;;  %v412_v61 = vpop.f32.mrf.mxu1 }
 0x1bd   :  { %v927_v62 = vpop.eup %926  ;;  %864 = vmatprep.mubr.f32.mxu0 %v925_v60  ;;  %v413_v63 = vadd.f32 %v661_v35, %v412_v61  ;;  %940 = vtanh.f32 %v418_v59 }
 0x1be   :  { %865 = vmatmul.mubr.f32.gmra.mxu0 %v927_v62  ;;  %v825_v0 = vpop.f32.mrf.mxu1  ;;  %v929_v1 = vpop.eup %928 }
 0x1bf   :  { %942 = vtanh.f32 %v413_v63  ;;  %v428_v2 = vadd.f32 %v825_v0, %v661_v35 }
 0x1c0   :  { %v931_v3 = vpop.eup %930  ;;  %v422_v4 = vpop.f32.mrf.mxu1 }
 0x1c1   :  { %867 = vmatprep.mubr.f32.mxu0 %v931_v3  ;;  %v423_v5 = vadd.f32 %v661_v35, %v422_v4  ;;  %944 = vtanh.f32 %v428_v2 }
 0x1c2   :  { %868 = vmatmul.mubr.f32.gmra.mxu0 %v929_v1  ;;  %v828_v6 = vpop.f32.mrf.mxu1  ;;  %v933_v7 = vpop.eup %932 }
 0x1c3   :  { %946 = vtanh.f32 %v423_v5  ;;  %v438_v8 = vadd.f32 %v828_v6, %v661_v35 }
 0x1c4   :  { %v935_v9 = vpop.eup %934  ;;  %v432_v10 = vpop.f32.mrf.mxu1 }
 0x1c5   :  { %870 = vmatprep.mubr.f32.mxu0 %v935_v9  ;;  %v433_v11 = vadd.f32 %v661_v35, %v432_v10  ;;  %948 = vtanh.f32 %v438_v8 }
 0x1c6   :  { %871 = vmatmul.mubr.f32.gmra.mxu0 %v933_v7  ;;  %v937_v12 = vpop.eup %936 }
 0x1c7   :  { %950 = vtanh.f32 %v433_v11 }
 0x1c8   :  { %v939_v13 = vpop.eup %938 }
 0x1c9   :  { %873 = vmatprep.mubr.f32.mxu0 %v939_v13 }
 0x1ca   :  { %874 = vmatmul.mubr.f32.gmra.mxu0 %v937_v12  ;;  %v941_v14 = vpop.eup %940 }
 0x1cc   :  { %v943_v15 = vpop.eup %942 }
 0x1cd   :  { %876 = vmatprep.mubr.f32.mxu0 %v943_v15 }
 0x1ce   :  { %877 = vmatmul.mubr.f32.gmra.mxu0 %v941_v14  ;;  %v945_v16 = vpop.eup %944 }
 0x1d0   :  { %v947_v17 = vpop.eup %946 }
 0x1d1   :  { %879 = vmatprep.mubr.f32.mxu0 %v947_v17 }
 0x1d2   :  { %880 = vmatmul.mubr.f32.gmra.mxu0 %v945_v16  ;;  %v949_v18 = vpop.eup %948 }
 0x1d4   :  { %v951_v19 = vpop.eup %950 }
 0x1d5   :  { %882 = vmatprep.mubr.f32.mxu0 %v951_v19 }
 0x1d6   :  { %883 = vmatmul.mubr.f32.gmra.mxu0 %v949_v18 }
 0x27a   :  { %v863_v20 = vpop.f32.mrf.mxu0 }
 0x27b   :  { %v533_v25 = vadd.f32 %v863_v20, %v662_v21 }
 0x27c   :  { %v527_v22 = vpop.f32.mrf.mxu0 }
 0x27d   :  { %v528_v23 = vadd.f32 %v662_v21, %v527_v22 }
 0x27e   :  { %v866_v24 = vpop.f32.mrf.mxu0 }
 0x27f   :  { %606 = vxpose.xlu0.b32.start [1/16] (narrow) %v528_v23, 8  ;;  %v543_v29 = vadd.f32 %v866_v24, %v662_v21 }
 0x280   :  { %v537_v26 = vpop.f32.mrf.mxu0 }
 0x281   :  { %v538_v27 = vadd.f32 %v662_v21, %v537_v26 }
 0x282   :  { %v869_v28 = vpop.f32.mrf.mxu0 }
 0x283   :  { %607 = vxpose.xlu0.b32.cont [2/16] (narrow) %v533_v25, 8  ;;  %v553_v33 = vadd.f32 %v869_v28, %v662_v21 }
 0x284   :  { %v547_v30 = vpop.f32.mrf.mxu0 }
 0x285   :  { %v548_v31 = vadd.f32 %v662_v21, %v547_v30 }
 0x286   :  { %v872_v32 = vpop.f32.mrf.mxu0 }
 0x287   :  { %608 = vxpose.xlu0.b32.cont [3/16] (narrow) %v538_v27, 8  ;;  %v563_v37 = vadd.f32 %v872_v32, %v662_v21 }
 0x288   :  { %v557_v34 = vpop.f32.mrf.mxu0 }
 0x289   :  { %v558_v35 = vadd.f32 %v662_v21, %v557_v34 }
 0x28a   :  { %v875_v36 = vpop.f32.mrf.mxu0 }
 0x28b   :  { %609 = vxpose.xlu0.b32.cont [4/16] (narrow) %v543_v29, 8  ;;  %v573_v41 = vadd.f32 %v875_v36, %v662_v21 }
 0x28c   :  { %v567_v38 = vpop.f32.mrf.mxu0 }
 0x28d   :  { %v568_v39 = vadd.f32 %v662_v21, %v567_v38 }
 0x28e   :  { %v878_v40 = vpop.f32.mrf.mxu0 }
 0x28f   :  { %610 = vxpose.xlu0.b32.cont [5/16] (narrow) %v548_v31, 8  ;;  %v583_v45 = vadd.f32 %v878_v40, %v662_v21 }
 0x290   :  { %v577_v42 = vpop.f32.mrf.mxu0 }
 0x291   :  { %v578_v43 = vadd.f32 %v662_v21, %v577_v42 }
 0x292   :  { %v881_v44 = vpop.f32.mrf.mxu0 }
 0x293   :  { %611 = vxpose.xlu0.b32.cont [6/16] (narrow) %v553_v33, 8  ;;  %v593_v49 = vadd.f32 %v881_v44, %v662_v21 }
 0x294   :  { %v587_v46 = vpop.f32.mrf.mxu0 }
 0x295   :  { %v588_v47 = vadd.f32 %v662_v21, %v587_v46 }
 0x296   :  { %v884_v48 = vpop.f32.mrf.mxu0 }
 0x297   :  { %612 = vxpose.xlu0.b32.cont [7/16] (narrow) %v558_v35, 8  ;;  %v603_v52 = vadd.f32 %v884_v48, %v662_v21 }
 0x298   :  { %v597_v50 = vpop.f32.mrf.mxu0 }
 0x299   :  { %v598_v51 = vadd.f32 %v662_v21, %v597_v50 }
 0x29b   :  { %613 = vxpose.xlu0.b32.cont [8/16] (narrow) %v563_v37, 8 }
 0x29f   :  { %614 = vxpose.xlu0.b32.cont [9/16] (narrow) %v568_v39, 8 }
 0x2a3   :  { %615 = vxpose.xlu0.b32.cont [10/16] (narrow) %v573_v41, 8 }
 0x2a7   :  { %616 = vxpose.xlu0.b32.cont [11/16] (narrow) %v578_v43, 8 }
 0x2ab   :  { %617 = vxpose.xlu0.b32.cont [12/16] (narrow) %v583_v45, 8 }
 0x2af   :  { %618 = vxpose.xlu0.b32.cont [13/16] (narrow) %v588_v47, 8 }
 0x2b3   :  { %619 = vxpose.xlu0.b32.cont [14/16] (narrow) %v593_v49, 8 }
 0x2b7   :  { %620 = vxpose.xlu0.b32.cont [15/16] (narrow) %v598_v51, 8 }
 0x2bb   :  { %621 = vxpose.xlu0.b32.end [16/16] (narrow) %v603_v52, 8 }
 0x2fb   :  { %v622_v53 = vpop.trf.xlu0 }
 0x2fc   :  { %638 = vst [vmem:[%s1064_s2] sm:$0xff] %v622_v53 }
 0x2fd   :  { %643 = vsyncpa [#allocation3], 1 }

</bundles_post_ra>
